<compile_context>
chip_gen: v6e
topology: v6e:2x2x1
jax: 0.10.0
libtpu: 0.0.40
codegen_flags: <defaults>
</compile_context>

<pallas_src>
import math

import jax
import jax.numpy as jnp
from jax.experimental import pallas as pl
from jax.experimental.pallas import tpu as pltpu

HIDDEN1 = 128
HIDDEN2 = 256
LANE = 128          # lane width; padded output width
TB_MAX = 512        # max batch tile (multiple of 16); working set stays tiny


def _round_up(x, m):
    return ((x + m - 1) // m) * m


# --------------------------------------------------------------------------
# Kernel: fused 3-layer MLP on one batch tile. Weights/biases are VMEM
# resident (index_map -> 0), activations tiled over batch.
# --------------------------------------------------------------------------
def qnetwork_kernel(x_ref, w1_ref, b1_ref, w2_ref, b2_ref, w3_ref, b3_ref,
                    out_ref):
    # fc1 + ReLU  (bf16 MXU operands, f32 accumulation, f32 bias/ReLU)
    h1 = jnp.dot(x_ref[...], w1_ref[...], preferred_element_type=jnp.float32)
    h1 = jnp.maximum(h1 + b1_ref[...], 0.0).astype(jnp.bfloat16)
    # fc2 + ReLU
    h2 = jnp.dot(h1, w2_ref[...], preferred_element_type=jnp.float32)
    h2 = jnp.maximum(h2 + b2_ref[...], 0.0).astype(jnp.bfloat16)
    # fc3 (no activation) -> lane-dense 128-wide padded output, stored bf16
    out = jnp.dot(h2, w3_ref[...], preferred_element_type=jnp.float32)
    out_ref[...] = (out + b3_ref[...]).astype(out_ref.dtype)


# --------------------------------------------------------------------------
# One-time parameter preparation (padding + bf16 cast) — NOT per call.
# --------------------------------------------------------------------------
def prepare_params(params, state_size, num_actions):
    w1, b1, w2, b2, w3, b3 = params
    s_pad = _round_up(state_size, 8)            # sublane-aligned fc1 K
    w1p = jnp.zeros((s_pad, HIDDEN1), jnp.bfloat16).at[:state_size, :].set(
        w1.astype(jnp.bfloat16))
    w2p = w2.astype(jnp.bfloat16)
    w3p = jnp.zeros((HIDDEN2, LANE), jnp.bfloat16).at[:, :num_actions].set(
        w3.astype(jnp.bfloat16))
    b1p = b1.reshape(1, HIDDEN1).astype(jnp.float32)
    b2p = b2.reshape(1, HIDDEN2).astype(jnp.float32)
    b3p = jnp.zeros((1, LANE), jnp.float32).at[:, :num_actions].set(
        b3.reshape(1, -1).astype(jnp.float32))
    return {
        "w1p": w1p, "b1p": b1p, "w2p": w2p, "b2p": b2p, "w3p": w3p, "b3p": b3p,
        "state_size": state_size, "s_pad": s_pad, "num_actions": num_actions,
    }


# --------------------------------------------------------------------------
# Forward: x [B, state_size] f32  ->  [B, num_actions] f32
# --------------------------------------------------------------------------
def qnetwork_forward(x, prepped, *, slice_output=True):
    batch, state_size = x.shape
    assert state_size == prepped["state_size"]
    s_pad = prepped["s_pad"]
    num_actions = prepped["num_actions"]

    # Batch tiling: multiple of 16 (bf16 sublane packing). If the padded
    # batch is big enough, force >= 2 grid steps so both v7x TensorCores
    # engage (one extra ~0.35us step on single-core chips).
    b_pad16 = _round_up(max(batch, 16), 16)
    tb = min(TB_MAX, b_pad16)
    if b_pad16 >= 32 and (b_pad16 // tb) < 2:
        tb = _round_up((b_pad16 + 1) // 2, 16)
    b_pad = _round_up(b_pad16, tb)
    grid = (b_pad // tb,)

    # Only x is touched per call; keep explicit zero padding on the K dim.
    xb = x.astype(jnp.bfloat16)
    if b_pad != batch or s_pad != state_size:
        xp = jnp.zeros((b_pad, s_pad), jnp.bfloat16)
        xp = xp.at[:batch, :state_size].set(xb)
    else:
        xp = xb

    w1p, b1p = prepped["w1p"], prepped["b1p"]
    w2p, b2p = prepped["w2p"], prepped["b2p"]
    w3p, b3p = prepped["w3p"], prepped["b3p"]

    resident = lambda a: pl.BlockSpec(a.shape, lambda i, _n=a.ndim: (0,) * _n)
    in_specs = [
        pl.BlockSpec((tb, s_pad), lambda i: (i, 0)),   # x tile over batch
        resident(w1p), resident(b1p),
        resident(w2p), resident(b2p),
        resident(w3p), resident(b3p),
    ]
    out_specs = pl.BlockSpec((tb, LANE), lambda i: (i, 0))

    flops = 2 * b_pad * (s_pad * HIDDEN1 + HIDDEN1 * HIDDEN2 + HIDDEN2 * LANE)
    bytes_accessed = (xp.size * 2
                      + w1p.size * 2 + w2p.size * 2 + w3p.size * 2
                      + b1p.size * 4 + b2p.size * 4 + b3p.size * 4
                      + b_pad * LANE * 2)                     # bf16 output

    out_padded = pl.pallas_call(
        qnetwork_kernel,
        out_shape=jax.ShapeDtypeStruct((b_pad, LANE), jnp.bfloat16),
        grid=grid,
        in_specs=in_specs,
        out_specs=out_specs,
        compiler_params=pltpu.CompilerParams(
            dimension_semantics=(pltpu.PARALLEL,)),
        cost_estimate=pl.CostEstimate(
            flops=flops, transcendentals=0, bytes_accessed=bytes_accessed),
    )(xp, w1p, b1p, w2p, b2p, w3p, b3p)

    if not slice_output:
        # Downstream consumer accepts the padded (b_pad, 128) bf16 block
        # (e.g. a fused-argmax consumer); skip the extra slice dispatch.
        return out_padded
    return out_padded[:batch, :num_actions].astype(jnp.float32)


# --------------------------------------------------------------------------
# Init + reference (for the self-check).
# --------------------------------------------------------------------------
def init_params(key, state_size, num_actions):
    """Deterministic init mimicking nn.Linear's U(-1/sqrt(fan_in), .)."""
    def linear(key, fan_in, fan_out):
        kw, kb = jax.random.split(key)
        bound = 1.0 / math.sqrt(fan_in)
        w = jax.random.uniform(kw, (fan_in, fan_out), jnp.float32,
                               minval=-bound, maxval=bound)
        b = jax.random.uniform(kb, (1, fan_out), jnp.float32,
                               minval=-bound, maxval=bound)
        return w, b

    k1, k2, k3 = jax.random.split(key, 3)
    w1, b1 = linear(k1, state_size, HIDDEN1)
    w2, b2 = linear(k2, HIDDEN1, HIDDEN2)
    w3, b3 = linear(k3, HIDDEN2, num_actions)
    return (w1, b1, w2, b2, w3, b3)


def reference_forward(x, params):
    w1, b1, w2, b2, w3, b3 = params
    h1 = jnp.maximum(x @ w1 + b1, 0.0)
    h2 = jnp.maximum(h1 @ w2 + b2, 0.0)
    return h2 @ w3 + b3


if __name__ == "__main__":
    batch = 8
    state_size = 16
    num_actions = 4

    key = jax.random.PRNGKey(0)
    kx, kp = jax.random.split(key)
    x = jax.random.normal(kx, (batch, state_size), jnp.float32)
    params = init_params(kp, state_size, num_actions)

    # One-time parameter prep (padding + bf16 cast), then a lean forward.
    prepped = prepare_params(params, state_size, num_actions)

    out = qnetwork_forward(x, prepped)
    out = jax.block_until_ready(out)

    ref = reference_forward(x, params)
    assert out.shape == (batch, num_actions)
    # bf16 operands + bf16 output store with f32 accumulation -> loosened
    # tolerance vs the f32 reference.
    assert jnp.allclose(out, ref, atol=2e-2, rtol=2e-2), "mismatch vs reference"

    print("KERNEL_OK")
</pallas_src>

<mosaic_0001>
module attributes {stable_mosaic.version = 11 : i64} {
  func.func @qnetwork_kernel(%arg0: i32, %arg1: memref<16x16xbf16, #tpu.memory_space<vmem>>, %arg2: memref<16x128xbf16, #tpu.memory_space<vmem>>, %arg3: memref<1x128xf32, #tpu.memory_space<vmem>>, %arg4: memref<128x256xbf16, #tpu.memory_space<vmem>>, %arg5: memref<1x256xf32, #tpu.memory_space<vmem>>, %arg6: memref<256x128xbf16, #tpu.memory_space<vmem>>, %arg7: memref<1x128xf32, #tpu.memory_space<vmem>>, %arg8: memref<16x128xbf16, #tpu.memory_space<vmem>>) attributes {dimension_semantics = [#tpu.dimension_semantics<parallel>], iteration_bounds = array<i64: 1>, scalar_prefetch = 0 : i64, scratch_operands = 0 : i64, tpu.core_type = #tpu.core_type<tc>, window_params = [{transform_indices = @transform_0, window_bounds = array<i64: 16, 16>}, {pipeline_mode = #tpu.pipeline_mode<synchronous>, transform_indices = @transform_1, window_bounds = array<i64: 16, 128>}, {pipeline_mode = #tpu.pipeline_mode<synchronous>, transform_indices = @transform_2, window_bounds = array<i64: 1, 128>}, {pipeline_mode = #tpu.pipeline_mode<synchronous>, transform_indices = @transform_3, window_bounds = array<i64: 128, 256>}, {pipeline_mode = #tpu.pipeline_mode<synchronous>, transform_indices = @transform_4, window_bounds = array<i64: 1, 256>}, {pipeline_mode = #tpu.pipeline_mode<synchronous>, transform_indices = @transform_5, window_bounds = array<i64: 256, 128>}, {pipeline_mode = #tpu.pipeline_mode<synchronous>, transform_indices = @transform_6, window_bounds = array<i64: 1, 128>}, {transform_indices = @transform_7, window_bounds = array<i64: 16, 128>}]} {
    %c0 = arith.constant 0 : index
    %c0_0 = arith.constant 0 : index
    %0 = vector.load %arg1[%c0, %c0_0] : memref<16x16xbf16, #tpu.memory_space<vmem>>, vector<16x16xbf16>
    %c0_1 = arith.constant 0 : index
    %c0_2 = arith.constant 0 : index
    %1 = vector.load %arg2[%c0_1, %c0_2] : memref<16x128xbf16, #tpu.memory_space<vmem>>, vector<16x128xbf16>
    %cst = arith.constant dense<0.000000e+00> : vector<16x128xf32>
    %2 = tpu.matmul %0, %1, %cst {dimension_numbers = #tpu.dot_dimension_numbers<[1], [0], [0], [1], [0, 0, 1, 1], [], []>} : vector<16x16xbf16>, vector<16x128xbf16>, vector<16x128xf32> -> vector<16x128xf32>
    %c0_3 = arith.constant 0 : index
    %c0_4 = arith.constant 0 : index
    %3 = vector.load %arg3[%c0_3, %c0_4] : memref<1x128xf32, #tpu.memory_space<vmem>>, vector<1x128xf32>
    %4 = vector.broadcast %3 : vector<1x128xf32> to vector<16x128xf32>
    %5 = arith.addf %2, %4 : vector<16x128xf32>
    %cst_5 = arith.constant 0.000000e+00 : f32
    %6 = vector.broadcast %cst_5 : f32 to vector<16x128xf32>
    %7 = arith.maximumf %5, %6 : vector<16x128xf32>
    %8 = arith.truncf %7 : vector<16x128xf32> to vector<16x128xbf16>
    %c0_6 = arith.constant 0 : index
    %c0_7 = arith.constant 0 : index
    %9 = vector.load %arg4[%c0_6, %c0_7] : memref<128x256xbf16, #tpu.memory_space<vmem>>, vector<128x256xbf16>
    %cst_8 = arith.constant dense<0.000000e+00> : vector<16x256xf32>
    %10 = tpu.matmul %8, %9, %cst_8 {dimension_numbers = #tpu.dot_dimension_numbers<[1], [0], [0], [1], [0, 0, 1, 1], [], []>} : vector<16x128xbf16>, vector<128x256xbf16>, vector<16x256xf32> -> vector<16x256xf32>
    %c0_9 = arith.constant 0 : index
    %c0_10 = arith.constant 0 : index
    %11 = vector.load %arg5[%c0_9, %c0_10] : memref<1x256xf32, #tpu.memory_space<vmem>>, vector<1x256xf32>
    %12 = vector.broadcast %11 : vector<1x256xf32> to vector<16x256xf32>
    %13 = arith.addf %10, %12 : vector<16x256xf32>
    %cst_11 = arith.constant 0.000000e+00 : f32
    %14 = vector.broadcast %cst_11 : f32 to vector<16x256xf32>
    %15 = arith.maximumf %13, %14 : vector<16x256xf32>
    %16 = arith.truncf %15 : vector<16x256xf32> to vector<16x256xbf16>
    %c0_12 = arith.constant 0 : index
    %c0_13 = arith.constant 0 : index
    %17 = vector.load %arg6[%c0_12, %c0_13] : memref<256x128xbf16, #tpu.memory_space<vmem>>, vector<256x128xbf16>
    %cst_14 = arith.constant dense<0.000000e+00> : vector<16x128xf32>
    %18 = tpu.matmul %16, %17, %cst_14 {dimension_numbers = #tpu.dot_dimension_numbers<[1], [0], [0], [1], [0, 0, 1, 1], [], []>} : vector<16x256xbf16>, vector<256x128xbf16>, vector<16x128xf32> -> vector<16x128xf32>
    %c0_15 = arith.constant 0 : index
    %c0_16 = arith.constant 0 : index
    %19 = vector.load %arg7[%c0_15, %c0_16] : memref<1x128xf32, #tpu.memory_space<vmem>>, vector<1x128xf32>
    %20 = vector.broadcast %19 : vector<1x128xf32> to vector<16x128xf32>
    %21 = arith.addf %18, %20 : vector<16x128xf32>
    %22 = arith.truncf %21 : vector<16x128xf32> to vector<16x128xbf16>
    %c0_17 = arith.constant 0 : index
    %c0_18 = arith.constant 0 : index
    %23 = vector.load %arg8[%c0_17, %c0_18] : memref<16x128xbf16, #tpu.memory_space<vmem>>, vector<16x128xbf16>
    tpu.vector_store %arg8[%c0_17, %c0_18], %22 {strides = array<i32>} : memref<16x128xbf16, #tpu.memory_space<vmem>>, vector<16x128xbf16>,
    return
  }
  func.func @transform_0(%arg0: i32) -> (i32, i32) {
    %c0_i32 = arith.constant 0 : i32
    %c0_i32_0 = arith.constant 0 : i32
    return %arg0, %c0_i32 : i32, i32
  }
  func.func @transform_1(%arg0: i32) -> (i32, i32) {
    %c0_i32 = arith.constant 0 : i32
    %c0_i32_0 = arith.constant 0 : i32
    %c0_i32_1 = arith.constant 0 : i32
    return %c0_i32, %c0_i32_0 : i32, i32
  }
  func.func @transform_2(%arg0: i32) -> (i32, i32) {
    %c0_i32 = arith.constant 0 : i32
    %c0_i32_0 = arith.constant 0 : i32
    %c0_i32_1 = arith.constant 0 : i32
    return %c0_i32, %c0_i32_0 : i32, i32
  }
  func.func @transform_3(%arg0: i32) -> (i32, i32) {
    %c0_i32 = arith.constant 0 : i32
    %c0_i32_0 = arith.constant 0 : i32
    %c0_i32_1 = arith.constant 0 : i32
    return %c0_i32, %c0_i32_0 : i32, i32
  }
  func.func @transform_4(%arg0: i32) -> (i32, i32) {
    %c0_i32 = arith.constant 0 : i32
    %c0_i32_0 = arith.constant 0 : i32
    %c0_i32_1 = arith.constant 0 : i32
    return %c0_i32, %c0_i32_0 : i32, i32
  }
  func.func @transform_5(%arg0: i32) -> (i32, i32) {
    %c0_i32 = arith.constant 0 : i32
    %c0_i32_0 = arith.constant 0 : i32
    %c0_i32_1 = arith.constant 0 : i32
    return %c0_i32, %c0_i32_0 : i32, i32
  }
  func.func @transform_6(%arg0: i32) -> (i32, i32) {
    %c0_i32 = arith.constant 0 : i32
    %c0_i32_0 = arith.constant 0 : i32
    %c0_i32_1 = arith.constant 0 : i32
    return %c0_i32, %c0_i32_0 : i32, i32
  }
  func.func @transform_7(%arg0: i32) -> (i32, i32) {
    %c0_i32 = arith.constant 0 : i32
    %c0_i32_0 = arith.constant 0 : i32
    return %arg0, %c0_i32 : i32, i32
  }
}

</mosaic_0001>

<bundles_post_ra>
// kernel: tpu_custom_call.1
= control target key start
LH: loop header
LB: loop body
LE: loop exit
PB: predicated region body
PF: predicated region fallthrough
CT: control target
= control target key end

     0   :  { %12 = vsyncpa [#allocation3], 0  ;;  %s841_s0 = inlined_call_operand.hbm [shape: bf16[16,16], index: 0, kind: input, shape index: {}]   ;;  %s842_s1 = inlined_call_operand.hbm [shape: bf16[16,128], index: 1, kind: input, shape index: {}]   ;;  %s843_s2 = inlined_call_operand.vmem [shape: f32[1,128], index: 2, kind: input, shape index: {}]   ;;  %s844_s3 = inlined_call_operand.hbm [shape: bf16[128,256], index: 3, kind: input, shape index: {}]   ;;  %s845_s4 = inlined_call_operand.vmem [shape: f32[1,256], index: 4, kind: input, shape index: {}]   ;;  %s846_s5 = inlined_call_operand.hbm [shape: bf16[256,128], index: 5, kind: input, shape index: {}]   ;;  %s847_s6 = inlined_call_operand.vmem [shape: f32[1,128], index: 6, kind: input, shape index: {}]   ;;  %s848_s7 = inlined_call_operand.hbm [shape: bf16[16,128], index: 7, kind: output, shape index: {}]  }
   0x1   :  { %13 = vsyncpa [#allocation6], 0 }
   0x2   :  { %14 = vsyncpa [#allocation9], 0 }
   0x3   :  { %15 = vsyncpa [#allocation4], 0  ;;  %s753_s24 = smov [#allocation5]   ;;  %s754_s26 = smov [#allocation2]  }
   0x4   :  { %s33_s25 = sshll.u32 %s753_s24, 4  ;;  %s21_s27 = sshll.u32 %s754_s26, 4  ;;  %s34_s25 = int_to_ptr.vmem [resolvable:$true] %s33_s25  ;;  %s22_s27 = int_to_ptr.vmem [resolvable:$true] %s21_s27 }
   0x5   :  { %s653_s28 = scalar_lea.vmem %s34_s25, 128  ;;  %p658_p1 = scmp.lt.s32.totalorder %s34_s25, %s34_s25 }
   0x6   :  { %p654_p0 = scmp.ne.s32.totalorder %s34_s25, %s653_s28  ;;  %p659_p2 = scmp.lt.s32.totalorder %s653_s28, %s653_s28 }
   0x8   :  { %p660_p3 = por %p659_p2, %p658_p1 }
   0xa   :  { %p661_p4 = pnand %p660_p3, %p654_p0 }
   0xc   :  { %664 = shalt.err (!%p661_p4)
}
   0xd   :  { %s755_s29 = smov 64   ;;  %s756_s30 = smov 4  }
   0xe   :  { %39 = dma.hbm_to_vmem [thread:$0]  %s842_s1, 128, %s34_s25, [#allocation6], %s755_s29, %s755_s29, %s756_s30  }
   0xf   :  { %s673_s10 = scalar_lea.vmem %s22_s27, 128  ;;  %p678_p6 = scmp.lt.s32.totalorder %s22_s27, %s22_s27 }
  0x10   :  { %p674_p5 = scmp.ne.s32.totalorder %s22_s27, %s673_s10  ;;  %p679_p7 = scmp.lt.s32.totalorder %s673_s10, %s673_s10 }
  0x12   :  { %p680_p8 = por %p679_p7, %p678_p6 }
  0x14   :  { %p681_p9 = pnand %p680_p8, %p674_p5 }
  0x16   :  { %684 = shalt.err (!%p681_p9)
}
  0x17   :  { %27 = dma.hbm_to_vmem [thread:$0]  %s841_s0, 128, %s22_s27, [#allocation3], %s755_s29, %s755_s29, %s756_s30  }
  0x18   :  { %s757_s13 = smov [#allocation7]  }
  0x19   :  { %s47_s14 = sshll.u32 %s757_s13, 4  ;;  %s48_s14 = int_to_ptr.vmem [resolvable:$true] %s47_s14 }
  0x1a   :  { %s693_s15 = scalar_lea.vmem %s48_s14, 2048  ;;  %p698_p11 = scmp.lt.s32.totalorder %s48_s14, %s48_s14 }
  0x1b   :  { %p694_p10 = scmp.ne.s32.totalorder %s48_s14, %s693_s15  ;;  %p699_p12 = scmp.lt.s32.totalorder %s693_s15, %s693_s15 }
  0x1d   :  { %p700_p13 = por %p699_p12, %p698_p11 }
  0x1f   :  { %p701_p0 = pnand %p700_p13, %p694_p10 }
  0x21   :  { %704 = shalt.err (!%p701_p0)
}
  0x22   :  { %s758_s1 = smov 128   ;;  %s759_s16 = smov 8  }
  0x23   :  { %53 = dma.hbm_to_vmem [thread:$0]  %s844_s3, 2048, %s48_s14, [#allocation6], %s758_s1, %s758_s1, %s759_s16  }
  0x24   :  { %s760_s19 = smov [#allocation8]  }
  0x25   :  { %s61_s20 = sshll.u32 %s760_s19, 4  ;;  %s62_s20 = int_to_ptr.vmem [resolvable:$true] %s61_s20 }
  0x26   :  { %s713_s0 = scalar_lea.vmem %s62_s20, 2048  ;;  %p718_p2 = scmp.lt.s32.totalorder %s62_s20, %s62_s20 }
  0x27   :  { %p714_p1 = scmp.ne.s32.totalorder %s62_s20, %s713_s0  ;;  %p719_p3 = scmp.lt.s32.totalorder %s713_s0, %s713_s0 }
  0x29   :  { %p720_p4 = por %p719_p3, %p718_p2 }
  0x2b   :  { %p721_p5 = pnand %p720_p4, %p714_p1 }
  0x2d   :  { %724 = shalt.err (!%p721_p5)
}
  0x2e   :  { %67 = dma.hbm_to_vmem [thread:$0]  %s846_s5, 2048, %s62_s20, [#allocation9], %s755_s29, %s755_s29, %s756_s30  }
  0x2f   :  { %745 = dma.done.wait [#allocation3], 128  }
  0x30   :  { %746 = vsyncadd [#allocation3], 4294967168 }
  0x31   :  { %747 = dma.done.wait [#allocation6], 2176  }
  0x32   :  { %748 = vsyncadd [#allocation6], 4294965120 }
  0x33   :  { %749 = dma.done.wait [#allocation9], 2048  }
  0x34   :  { %750 = vsyncadd [#allocation9], 4294965248  ;;  %v761_v0 = vmov 0.0   ;;  %vm762_vm0 = vmmov 0   ;;  %v603_v1 = vld [vmem:[#allocation5] sm:$0xff]   ;;  %v604_v2 = vld [vmem:[#allocation2] sm:$0xff]   ;;  %v171_v46 = vlaneseq }
  0x35   :  { %585 = vmatprep.subr.bf16.mxu0 %v761_v0  ;;  %587 = vmatprep.mubr.msk.bf16.mxu0 %vm762_vm0, %v761_v0  ;;  %vm105_vm1 = vcmask 130048   ;;  %v605_v3 = vld [vmem:[#allocation7 + $0x74] ss:$8 sps:$4 sm:$0xff]   ;;  %v607_v4 = vld [vmem:[#allocation7 + $0x70] ss:$8 sps:$4 sm:$0xff]   ;;  %v763_v19 = vmov 0  }
  0x36   :  { %586 = vmatpush3.bf16.msra.mxu0 %v603_v1  ;;  %261 = vmatprep.subr.bf16.mxu1 %v605_v3  ;;  %v608_v5 = vld [vmem:[#allocation7 + $0x64] ss:$8 sps:$4 sm:$0xff]   ;;  %v610_v6 = vld [vmem:[#allocation7 + $0x60] ss:$8 sps:$4 sm:$0xff]   ;;  %v611_v7 = vld [vmem:[#allocation7 + $0x54] ss:$8 sps:$4 sm:$0xff]  }
  0x37   :  { %262 = vmatpush1.bf16.msra.mxu1 %v607_v4  ;;  %v613_v8 = vld [vmem:[#allocation7 + $0x50] ss:$8 sps:$4 sm:$0xff]   ;;  %v614_v9 = vld [vmem:[#allocation7 + $0x44] ss:$8 sps:$4 sm:$0xff]   ;;  %v616_v10 = vld [vmem:[#allocation7 + $0x40] ss:$8 sps:$4 sm:$0xff]   ;;  %293 = vmatprep.mubr.bf16.mxu1 %v763_v19 }
  0x38   :  { %263 = vmatprep.subr.bf16.mxu1 %v608_v5  ;;  %v617_v11 = vld [vmem:[#allocation7 + $0x34] ss:$8 sps:$4 sm:$0xff]   ;;  %v619_v12 = vld [vmem:[#allocation7 + $0x30] ss:$8 sps:$4 sm:$0xff]   ;;  %v620_v13 = vld [vmem:[#allocation7 + $0x24] ss:$8 sps:$4 sm:$0xff]  }
  0x39   :  { %588 = vmatmul.mubr.msk.bf16.vlgmr.msra.gmra.mxu0 %vm105_vm1, %v604_v2  ;;  %v622_v14 = vld [vmem:[#allocation7 + $0x20] ss:$8 sps:$4 sm:$0xff]   ;;  %v623_v15 = vld [vmem:[#allocation7 + $0x14] ss:$8 sps:$4 sm:$0xff]   ;;  %v625_v16 = vld [vmem:[#allocation7 + $0x10] ss:$8 sps:$4 sm:$0xff]  }
  0x3a   :  { %v626_v17 = vld [vmem:[#allocation7 + $0x4] ss:$8 sps:$4 sm:$0xff]   ;;  %v628_v18 = vld [vmem:[#allocation7] ss:$8 sps:$4 sm:$0xff]   ;;  %v629_v20 = vld [vmem:[#allocation8 + $0x78] sm:$0xff]   ;;  %v172_v47 = vshrl.u32 %v171_v46, 7 }
  0x3b   :  { %264 = vmatpush1.bf16.msra.mxu1 %v610_v6  ;;  %v630_v21 = vld [vmem:[#allocation8 + $0x38] sm:$0xff]   ;;  %v631_v22 = vld [vmem:[#allocation8 + $0x70] sm:$0xff]   ;;  %563 = vmatprep.subr.bf16.mxu0 %v629_v20  ;;  %v633_v24 = vld [vmem:[#allocation8 + $0x68] sm:$0xff]   ;;  %s764_s25 = smov [#allocation10]  }
  0x3c   :  { %265 = vmatprep.subr.bf16.mxu1 %v611_v7  ;;  %564 = vmatpush3.bf16.msra.mxu0 %v630_v21  ;;  %v632_v23 = vld [vmem:[#allocation8 + $0x30] sm:$0xff]   ;;  %v634_v25 = vld [vmem:[#allocation8 + $0x28] sm:$0xff]   ;;  %v635_v26 = vld [vmem:[#allocation8 + $0x60] sm:$0xff]   ;;  %v177_v48 = vsub.s32 1, %v172_v47  ;;  %v173_v49 = vsub.s32 0, %v172_v47  ;;  %s501_s26 = sshll.u32 %s764_s25, 4  ;;  %s502_s26 = int_to_ptr.vmem [resolvable:$true] %s501_s26 }
  0x3d   :  { %565 = vmatprep.subr.bf16.mxu0 %v631_v22  ;;  %v636_v27 = vld [vmem:[#allocation8 + $0x20] sm:$0xff]   ;;  %v637_v28 = vld [vmem:[#allocation8 + $0x58] sm:$0xff]   ;;  %v515_v30 = vld [vmem:[%s843_s2] ss:$0 sm:$0xff]  ;;  %s725_s27 = scalar_lea.vmem %s502_s26, 128  ;;  %p730_p7 = scmp.lt.s32.totalorder %s502_s26, %s502_s26 }
  0x3e   :  { %v638_v29 = vld [vmem:[#allocation8 + $0x18] sm:$0xff]   ;;  %v639_v40 = vld [vmem:[#allocation8 + $0x50] sm:$0xff]   ;;  %v641_v42 = vld [vmem:[#allocation8 + $0x48] sm:$0xff]   ;;  %p726_p6 = scmp.ne.s32.totalorder %s502_s26, %s725_s27  ;;  %p731_p8 = scmp.lt.s32.totalorder %s725_s27, %s725_s27 }
  0x3f   :  { %266 = vmatpush1.bf16.msra.mxu1 %v613_v8  ;;  %v640_v41 = vld [vmem:[#allocation8 + $0x10] sm:$0xff]   ;;  %v642_v43 = vld [vmem:[#allocation8 + $0x8] sm:$0xff]   ;;  %v643_v44 = vld [vmem:[#allocation8 + $0x40] sm:$0xff]  }
  0x40   :  { %267 = vmatprep.subr.bf16.mxu1 %v614_v9  ;;  %566 = vmatpush3.bf16.msra.mxu0 %v632_v23  ;;  %v644_v45 = vld [vmem:[#allocation8] sm:$0xff]   ;;  %v169_v50 = vld [vmem:[%s845_s4] sm:$0x3]  ;;  %p732_p9 = por %p731_p8, %p730_p7 }
  0x41   :  { %567 = vmatprep.subr.bf16.mxu0 %v633_v24  ;;  %v178_v52 = vrot.slane %v169_v50, %v177_v48  ;;  %v174_v53 = vrot.slane %v169_v50, %v173_v49  ;;  %v535_v7 = vld [vmem:[%s847_s6] ss:$0 sm:$0xff] }
  0x42   :  { %p733_p10 = pnand %p732_p9, %p726_p6 }
  0x43   :  { %268 = vmatpush1.bf16.msra.mxu1 %v616_v10 }
  0x44   :  { %269 = vmatprep.subr.bf16.mxu1 %v617_v11  ;;  %568 = vmatpush3.bf16.msra.mxu0 %v634_v25 }
  0x45   :  { %569 = vmatprep.subr.bf16.mxu0 %v635_v26 }
  0x47   :  { %270 = vmatpush1.bf16.msra.mxu1 %v619_v12 }
  0x48   :  { %271 = vmatprep.subr.bf16.mxu1 %v620_v13  ;;  %570 = vmatpush3.bf16.msra.mxu0 %v636_v27 }
  0x49   :  { %571 = vmatprep.subr.bf16.mxu0 %v637_v28 }
  0x4b   :  { %272 = vmatpush1.bf16.msra.mxu1 %v622_v14 }
  0x4c   :  { %273 = vmatprep.subr.bf16.mxu1 %v623_v15  ;;  %572 = vmatpush3.bf16.msra.mxu0 %v638_v29 }
  0x4d   :  { %573 = vmatprep.subr.bf16.mxu0 %v639_v40 }
  0x4f   :  { %274 = vmatpush1.bf16.msra.mxu1 %v625_v16 }
  0x50   :  { %275 = vmatprep.subr.bf16.mxu1 %v626_v17  ;;  %574 = vmatpush3.bf16.msra.mxu0 %v640_v41 }
  0x51   :  { %575 = vmatprep.subr.bf16.mxu0 %v641_v42 }
  0x53   :  { %276 = vmatpush1.bf16.msra.mxu1 %v628_v18 }
  0x54   :  { %576 = vmatpush3.bf16.msra.mxu0 %v642_v43 }
  0x55   :  { %577 = vmatprep.subr.bf16.mxu0 %v643_v44 }
  0x58   :  { %578 = vmatpush3.bf16.msra.mxu0 %v644_v45 }
  0xf9   :  { %v143_v31 = vpop.f32.mrf.mxu0 }
  0xfa   :  { %v144_v33 = vadd.f32 %v515_v30, %v143_v31 }
  0xfb   :  { %v589_v32 = vpop.f32.mrf.mxu0 }
  0xfc   :  { %v150_v37 = vmax.f32 %v144_v33, 0.0 }
  0xfd   :  { %v146_v34 = vpop.f32.mrf.mxu0 }
  0xfe   :  { %v147_v35 = vadd.f32 %v515_v30, %v146_v34 }
  0xff   :  { %v590_v36 = vpop.f32.mrf.mxu0 }
 0x100   :  { %v151_v38 = vmax.f32 %v147_v35, 0.0 }
 0x102   :  { %v152_v39 = vpack.c.bf16 %v151_v38, %v150_v37 }
 0x104   :  { %294 = vmatmul.mubr.bf16.vlgmr.msra.gmra.mxu1 %v152_v39 }
 0x1c4   :  { %v295_v51 = vpop.f32.mrf.mxu1 }
 0x1c5   :  { %v296_v58 = vadd.f32 %v295_v51, %v174_v53 }
 0x1c6   :  { %v297_v54 = vpop.f32.mrf.mxu1 }
 0x1c7   :  { %v298_v56 = vadd.f32 %v297_v54, %v178_v52  ;;  %v304_v0 = vmax.f32 %v296_v58, 0.0 }
 0x1c8   :  { %v299_v55 = vpop.f32.mrf.mxu1 }
 0x1c9   :  { %v300_v57 = vadd.f32 %v299_v55, %v174_v53  ;;  %v305_v62 = vmax.f32 %v298_v56, 0.0 }
 0x1ca   :  { %v301_v59 = vpop.f32.mrf.mxu1 }
 0x1cb   :  { %v302_v60 = vadd.f32 %v301_v59, %v178_v52  ;;  %v306_v61 = vmax.f32 %v300_v57, 0.0 }
 0x1cd   :  { %v307_v63 = vmax.f32 %v302_v60, 0.0  ;;  %v308_v2 = vpack.c.bf16 %v306_v61, %v304_v0 }
 0x1cf   :  { %v309_v1 = vpack.c.bf16 %v307_v63, %v305_v62 }
 0x1d1   :  { %477 = vmatprep.mubr.bf16.mxu0 %v309_v1 }
 0x1d2   :  { %478 = vmatmul.mubr.bf16.vlgmr.msra.gmra.mxu0 %v308_v2 }
 0x292   :  { %v579_v3 = vpop.f32.mrf.mxu0 }
 0x294   :  { %v580_v4 = vpop.f32.mrf.mxu0 }
 0x295   :  { %v581_v6 = vadd.f32 %v580_v4, %v579_v3 }
 0x296   :  { %v582_v5 = vpop.f32.mrf.mxu0 }
 0x297   :  { %v480_v10 = vadd.f32 %v581_v6, %v535_v7 }
 0x298   :  { %v583_v8 = vpop.f32.mrf.mxu0 }
 0x299   :  { %v584_v9 = vadd.f32 %v583_v8, %v582_v5 }
 0x29b   :  { %v483_v11 = vadd.f32 %v584_v9, %v535_v7 }
 0x29d   :  { %v559_v12 = vpack.c.bf16 %v483_v11, %v480_v10 }
 0x29f   :  { %560 = vst [vmem:[#allocation10] sm:$0xff] %v559_v12  }
 0x2a0   :  { %736 = shalt.err (!%p733_p10)
}
 0x2a1   :  { %507 = dma.vmem_to_hbm [thread:$0]  %s502_s26, 128, %s848_s7, [#allocation4], %s755_s29, %s755_s29, %s756_s30  }
 0x2a2   :  { %751 = dma.done.wait [#allocation4], 128  }
 0x2a3   :  { %752 = vsyncadd [#allocation4], 4294967168 }
 0x2a4   :  { %511 = vsyncpa [#allocation3], 1 }
 0x2a5   :  { %512 = vsyncpa [#allocation6], 1 }
 0x2a6   :  { %513 = vsyncpa [#allocation9], 1 }
 0x2a7   :  { %514 = vsyncpa [#allocation4], 1 }

</bundles_post_ra>
